<compile_context>
chip_gen: v5e
topology: v5e:2x2
jax: 0.10.0
libtpu: 0.0.40
codegen_flags: <defaults>
</compile_context>

<pallas_src>
import functools
import math

import jax
import jax.numpy as jnp
from jax.experimental import pallas as pl
from jax.experimental.pallas import tpu as pltpu

LANE = 128          # TPU lane width: last dim of MXU operands / output stores
_MIB = 1 << 20


def _round_up(x, m):
    return (x + m - 1) // m * m


# ---------------------------------------------------------------------------
# Kernel: a chunk of consecutive layers, fully fused for one batch tile.
# ---------------------------------------------------------------------------
def _mlp_chunk_kernel(x_ref, *refs, layout, mxu_dtype):
    """refs = [per-layer weight arrays ..., o_ref].

    `layout` is a static tuple of (kind, has_bias) per layer:
      kind == 'W'  -> one folded dense weight  W_t = (u@v).T  (in_pad, out_pad)
      kind == 'UV' -> low-rank pair v_t (in_pad, mid_pad), u_t (mid_pad, out_pad)
    followed (if has_bias) by a (1, out_pad) f32 bias.
    Activations stay in vregs/VMEM across the statically-unrolled layer loop;
    they never round-trip HBM inside a chunk.
    """
    o_ref = refs[-1]
    w = refs[:-1]
    h = x_ref[...]
    k = 0
    for kind, has_bias in layout:
        # Weights are pre-cast in the wrapper; only the activation is cast here.
        h_in = h if mxu_dtype is None else h.astype(mxu_dtype)
        if kind == 'W':
            pre = jnp.dot(h_in, w[k][...], preferred_element_type=jnp.float32)
            k += 1
        else:  # 'UV'
            mid = jnp.dot(h_in, w[k][...], preferred_element_type=jnp.float32)
            if mxu_dtype is not None:
                mid = mid.astype(mxu_dtype)
            pre = jnp.dot(mid, w[k + 1][...], preferred_element_type=jnp.float32)
            k += 2
        if has_bias:
            pre = pre + w[k][...]          # (1, out_pad) f32, sublane-broadcast
            k += 1
        # LRLinear clamp(min=0); the interleaved nn.ReLU is idempotent with it.
        h = jnp.maximum(pre, 0.0)
    o_ref[...] = h.astype(o_ref.dtype)


# ---------------------------------------------------------------------------
# Parameter construction / one-time preparation
# ---------------------------------------------------------------------------
def init_mlp_params(key, indim, outdim, hidden_dim, n_hidden, rank):
    """Parameters matching MLP.__init__ with rank given (LRLinear, init='xavier').

    dims = [indim] + [hidden_dim]*n_hidden + [outdim]; last layer bias = None.
    Torch inits biases to zero; we use small random biases so the bias-add path
    is exercised numerically (forward semantics unchanged).
    """
    dims = [indim] + [hidden_dim] * n_hidden + [outdim]
    n_layers = len(dims) - 1
    layers = []
    for i, (inf, outf) in enumerate(zip(dims[:-1], dims[1:])):
        mid = min(rank, inf)
        key, ku, kv, kb = jax.random.split(key, 4)
        # xavier_uniform: u with gain=calculate_gain('relu')=sqrt(2), v with gain=1
        bu = math.sqrt(2.0) * math.sqrt(6.0 / (mid + outf))
        bv = 1.0 * math.sqrt(6.0 / (inf + mid))
        u = jax.random.uniform(ku, (outf, mid), jnp.float32, -bu, bu)
        v = jax.random.uniform(kv, (mid, inf), jnp.float32, -bv, bv)
        b = None if i == n_layers - 1 else 0.1 * jax.random.normal(kb, (outf,), jnp.float32)
        layers.append(dict(u=u, v=v, b=b))
    return layers


def prepare_mlp_params(layers, lane=LANE, mxu_dtype=None):
    """One-time weight prep (outside the kernel):
      * fold u@v into one dense pre-transposed weight when the padded low-rank
        form is not cheaper than a dense contraction,
      * zero-pad every feature dim to 128-lane multiples,
      * pre-cast MXU operands to `mxu_dtype` (biases stay f32).
    The first layer keeps the unpadded input dim so x needs no feature padding.
    """
    w_dtype = jnp.float32 if mxu_dtype is None else mxu_dtype
    prepped = []
    for i, lyr in enumerate(layers):
        u, v, b = lyr['u'], lyr['v'], lyr['b']
        outf, mid = u.shape
        _, inf = v.shape
        in_eff = inf if i == 0 else _round_up(inf, lane)   # prev layer's padded out
        out_p = _round_up(outf, lane)
        mid_p = _round_up(mid, lane)
        # Fold when the padded factorization costs at least as much as dense.
        fold = (in_eff * mid_p + mid_p * out_p) >= (in_eff * out_p)
        if fold:
            w = jnp.dot(u, v, precision=jax.lax.Precision.HIGHEST)      # (outf, inf)
            w_t = jnp.zeros((in_eff, out_p), jnp.float32).at[:inf, :outf].set(w.T)
            arrays = [w_t.astype(w_dtype)]
            kind = 'W'
        else:
            v_t = jnp.zeros((in_eff, mid_p), jnp.float32).at[:inf, :mid].set(v.T)
            u_t = jnp.zeros((mid_p, out_p), jnp.float32).at[:mid, :outf].set(u.T)
            arrays = [v_t.astype(w_dtype), u_t.astype(w_dtype)]
            kind = 'UV'
        has_bias = b is not None
        if has_bias:
            bias = jnp.zeros((1, out_p), jnp.float32).at[0, :outf].set(b)
            arrays.append(bias)                      # bias add / relu stay f32
        prepped.append(dict(kind=kind, has_bias=has_bias, arrays=arrays, out_pad=out_p))
    return dict(layers=prepped, mxu_dtype=mxu_dtype)


def _chunk_layers(layers_p, weight_budget_bytes):
    """Group consecutive layers so the (double-buffered) weight bytes per
    pallas_call stay under budget (keeps the fused design inside v7x VMEM)."""
    chunks, cur, cur_bytes = [], [], 0
    for lyr in layers_p:
        lb = 2 * sum(int(a.size) * a.dtype.itemsize for a in lyr['arrays'])
        if cur and cur_bytes + lb > weight_budget_bytes:
            chunks.append(cur)
            cur, cur_bytes = [], 0
        cur.append(lyr)
        cur_bytes += lb
    if cur:
        chunks.append(cur)
    return chunks


# ---------------------------------------------------------------------------
# Forward
# ---------------------------------------------------------------------------
def _run_chunk(h, chunk, bt, grid, mxu_dtype, out_dtype):
    B, in_feat = h.shape
    out_p = chunk[-1]['out_pad']

    flat_w = []
    layout = []
    in_specs = [pl.BlockSpec((bt, in_feat), lambda i: (i, 0))]      # x: batch-tiled
    for lyr in chunk:
        layout.append((lyr['kind'], lyr['has_bias']))
        for a in lyr['arrays']:
            flat_w.append(a)
            # full-array block, identical for every batch tile (loop-invariant)
            in_specs.append(pl.BlockSpec(a.shape, lambda i: (0, 0)))
    out_spec = pl.BlockSpec((bt, out_p), lambda i: (i, 0))

    # VMEM budget: double-buffered x/out tiles + weights (the pipeline
    # double-buffers them even though their block index is constant) + rough
    # working set for the unrolled per-layer intermediates.
    io_bytes = 2 * bt * (in_feat * h.dtype.itemsize + out_p * jnp.dtype(out_dtype).itemsize)
    w_bytes = 2 * sum(int(a.size) * a.dtype.itemsize for lyr in chunk for a in lyr['arrays'])
    max_feat = max([in_feat] + [lyr['out_pad'] for lyr in chunk])
    act_bytes = 4 * bt * max_feat * 4
    # >= default scoped limit everywhere, capped at 48 MiB (safe on v7x's 64 MiB).
    vmem_limit = int(max(32 * _MIB, min(48 * _MIB, 2 * (io_bytes + w_bytes + act_bytes))))

    kernel = functools.partial(_mlp_chunk_kernel, layout=tuple(layout), mxu_dtype=mxu_dtype)
    return pl.pallas_call(
        kernel,
        out_shape=jax.ShapeDtypeStruct((B, out_p), out_dtype),
        grid=grid,
        in_specs=in_specs,
        out_specs=out_spec,
        compiler_params=pltpu.CompilerParams(
            dimension_semantics=("parallel",),
            vmem_limit_bytes=vmem_limit),
    )(h, *flat_w)


def mlp_forward(x, prepped, outdim, *, batch_tile=256, weight_budget_bytes=24 * _MIB):
    """Fused MLP forward: one (or a few, if VMEM-limited) pallas_call(s) over a
    batch-parallel grid.  No batch padding of x; ragged last tile rows are
    discarded by the final slice."""
    mxu_dtype = prepped['mxu_dtype']
    layers_p = prepped['layers']
    B = x.shape[0]

    sub = 16 if mxu_dtype is not None else 8          # bf16 packs 2 rows/sublane
    if B <= sub:
        bt = B                                        # full-batch block (allowed)
    else:
        bt = min(_round_up(batch_tile, sub), _round_up(B, sub))
        # Aim for >= 2 parallel grid steps (pipelining + v7x's 2 TensorCores).
        if pl.cdiv(B, bt) < 2:
            bt = max(sub, _round_up(pl.cdiv(B, 2), sub))
    grid = (pl.cdiv(B, bt),)

    chunks = _chunk_layers(layers_p, weight_budget_bytes)
    h = x
    for ci, chunk in enumerate(chunks):
        is_last = ci == len(chunks) - 1
        # Intermediate chunk activations go to HBM in bf16 when using bf16 MXU.
        inter_dtype = jnp.float32 if (is_last or mxu_dtype is None) else mxu_dtype
        h = _run_chunk(h, chunk, bt, grid, mxu_dtype, inter_dtype)
    return h[:, :outdim]


def mlp_forward_ref(x, layers):
    """Pure-JAX reference matching the PyTorch MLP/LRLinear forward exactly."""
    h = x
    for lyr in layers:
        vxT = jnp.dot(lyr['v'], h.T, precision=jax.lax.Precision.HIGHEST)
        pre = jnp.dot(lyr['u'], vxT, precision=jax.lax.Precision.HIGHEST).T
        if lyr['b'] is not None:
            pre = pre + lyr['b']
        h = jnp.maximum(pre, 0.0)     # LRLinear clamp; interleaved ReLU is a no-op
    return h


if __name__ == "__main__":
    # Small shapes consistent with MLP(indim=32, outdim=16, hidden_dim=64,
    # n_hidden=2, rank=8): dims = [32, 64, 64, 16], 3 LRLinear layers.
    B, INDIM, HIDDEN, OUTDIM, N_HIDDEN, RANK = 8, 32, 64, 16, 2, 8

    key = jax.random.PRNGKey(0)
    key, kx = jax.random.split(key)
    x = jax.random.normal(kx, (B, INDIM), jnp.float32)

    params = init_mlp_params(key, INDIM, OUTDIM, HIDDEN, N_HIDDEN, RANK)
    ref = mlp_forward_ref(x, params)

    # f32 MXU path: tight check against the exact PyTorch-equivalent reference.
    prepped_f32 = prepare_mlp_params(params, mxu_dtype=None)
    out = jax.block_until_ready(mlp_forward(x, prepped_f32, OUTDIM))
    assert out.shape == (B, OUTDIM), out.shape
    assert jnp.allclose(out, ref, atol=1e-4, rtol=1e-4), \
        float(jnp.max(jnp.abs(out - ref)))

    # Multi-step parallel grid + ragged last batch tile (no batch padding in HBM).
    B2 = 20
    key, kx2 = jax.random.split(key)
    x2 = jax.random.normal(kx2, (B2, INDIM), jnp.float32)
    ref2 = mlp_forward_ref(x2, params)
    out2 = jax.block_until_ready(mlp_forward(x2, prepped_f32, OUTDIM, batch_tile=16))
    assert out2.shape == (B2, OUTDIM), out2.shape
    assert jnp.allclose(out2, ref2, atol=1e-4, rtol=1e-4), \
        float(jnp.max(jnp.abs(out2 - ref2)))

    # bf16 MXU inputs (weights pre-cast once in the wrapper), f32 accumulation.
    prepped_bf16 = prepare_mlp_params(params, mxu_dtype=jnp.bfloat16)
    out_bf16 = jax.block_until_ready(mlp_forward(x, prepped_bf16, OUTDIM))
    assert out_bf16.shape == (B, OUTDIM), out_bf16.shape
    assert jnp.allclose(out_bf16, ref, atol=1e-1, rtol=1e-1), \
        float(jnp.max(jnp.abs(out_bf16 - ref)))

    # TODO(synk): LRLinear n_modes mode scale/shift path not implemented (mode=None).
    # TODO(synk): rank=None (dense nn.Linear) path, 'id'/'id_alpha' init variants and
    # non-relu activations are not implemented; this covers the default relu +
    # xavier_uniform + rank (LRLinear) forward.
    print("KERNEL_OK")
</pallas_src>

<mosaic_0001>
module attributes {stable_mosaic.version = 11 : i64} {
  func.func @_mlp_chunk_kernel(%arg0: i32, %arg1: memref<8x32xf32, #tpu.memory_space<vmem>>, %arg2: memref<32x128xf32, #tpu.memory_space<vmem>>, %arg3: memref<1x128xf32, #tpu.memory_space<vmem>>, %arg4: memref<128x128xf32, #tpu.memory_space<vmem>>, %arg5: memref<1x128xf32, #tpu.memory_space<vmem>>, %arg6: memref<128x128xf32, #tpu.memory_space<vmem>>, %arg7: memref<8x128xf32, #tpu.memory_space<vmem>>) attributes {dimension_semantics = [#tpu.dimension_semantics<parallel>], iteration_bounds = array<i64: 1>, scalar_prefetch = 0 : i64, scratch_operands = 0 : i64, tpu.core_type = #tpu.core_type<tc>, window_params = [{transform_indices = @transform_0, window_bounds = array<i64: 8, 32>}, {pipeline_mode = #tpu.pipeline_mode<synchronous>, transform_indices = @transform_1, window_bounds = array<i64: 32, 128>}, {pipeline_mode = #tpu.pipeline_mode<synchronous>, transform_indices = @transform_2, window_bounds = array<i64: 1, 128>}, {pipeline_mode = #tpu.pipeline_mode<synchronous>, transform_indices = @transform_3, window_bounds = array<i64: 128, 128>}, {pipeline_mode = #tpu.pipeline_mode<synchronous>, transform_indices = @transform_4, window_bounds = array<i64: 1, 128>}, {pipeline_mode = #tpu.pipeline_mode<synchronous>, transform_indices = @transform_5, window_bounds = array<i64: 128, 128>}, {transform_indices = @transform_6, window_bounds = array<i64: 8, 128>}]} {
    %c0 = arith.constant 0 : index
    %c0_0 = arith.constant 0 : index
    %0 = vector.load %arg1[%c0, %c0_0] : memref<8x32xf32, #tpu.memory_space<vmem>>, vector<8x32xf32>
    %c0_1 = arith.constant 0 : index
    %c0_2 = arith.constant 0 : index
    %1 = vector.load %arg2[%c0_1, %c0_2] : memref<32x128xf32, #tpu.memory_space<vmem>>, vector<32x128xf32>
    %cst = arith.constant dense<0.000000e+00> : vector<8x128xf32>
    %2 = tpu.matmul %0, %1, %cst {dimension_numbers = #tpu.dot_dimension_numbers<[1], [0], [0], [1], [0, 0, 1, 1], [], []>} : vector<8x32xf32>, vector<32x128xf32>, vector<8x128xf32> -> vector<8x128xf32>
    %c0_3 = arith.constant 0 : index
    %c0_4 = arith.constant 0 : index
    %3 = vector.load %arg3[%c0_3, %c0_4] : memref<1x128xf32, #tpu.memory_space<vmem>>, vector<1x128xf32>
    %4 = vector.broadcast %3 : vector<1x128xf32> to vector<8x128xf32>
    %5 = arith.addf %2, %4 : vector<8x128xf32>
    %cst_5 = arith.constant 0.000000e+00 : f32
    %6 = vector.broadcast %cst_5 : f32 to vector<8x128xf32>
    %7 = arith.maximumf %5, %6 : vector<8x128xf32>
    %c0_6 = arith.constant 0 : index
    %c0_7 = arith.constant 0 : index
    %8 = vector.load %arg4[%c0_6, %c0_7] : memref<128x128xf32, #tpu.memory_space<vmem>>, vector<128x128xf32>
    %cst_8 = arith.constant dense<0.000000e+00> : vector<8x128xf32>
    %9 = tpu.matmul %7, %8, %cst_8 {dimension_numbers = #tpu.dot_dimension_numbers<[1], [0], [0], [1], [0, 0, 1, 1], [], []>} : vector<8x128xf32>, vector<128x128xf32>, vector<8x128xf32> -> vector<8x128xf32>
    %c0_9 = arith.constant 0 : index
    %c0_10 = arith.constant 0 : index
    %10 = vector.load %arg5[%c0_9, %c0_10] : memref<1x128xf32, #tpu.memory_space<vmem>>, vector<1x128xf32>
    %11 = vector.broadcast %10 : vector<1x128xf32> to vector<8x128xf32>
    %12 = arith.addf %9, %11 : vector<8x128xf32>
    %cst_11 = arith.constant 0.000000e+00 : f32
    %13 = vector.broadcast %cst_11 : f32 to vector<8x128xf32>
    %14 = arith.maximumf %12, %13 : vector<8x128xf32>
    %c0_12 = arith.constant 0 : index
    %c0_13 = arith.constant 0 : index
    %15 = vector.load %arg6[%c0_12, %c0_13] : memref<128x128xf32, #tpu.memory_space<vmem>>, vector<128x128xf32>
    %cst_14 = arith.constant dense<0.000000e+00> : vector<8x128xf32>
    %16 = tpu.matmul %14, %15, %cst_14 {dimension_numbers = #tpu.dot_dimension_numbers<[1], [0], [0], [1], [0, 0, 1, 1], [], []>} : vector<8x128xf32>, vector<128x128xf32>, vector<8x128xf32> -> vector<8x128xf32>
    %cst_15 = arith.constant 0.000000e+00 : f32
    %17 = vector.broadcast %cst_15 : f32 to vector<8x128xf32>
    %18 = arith.maximumf %16, %17 : vector<8x128xf32>
    %c0_16 = arith.constant 0 : index
    %c0_17 = arith.constant 0 : index
    %19 = vector.load %arg7[%c0_16, %c0_17] : memref<8x128xf32, #tpu.memory_space<vmem>>, vector<8x128xf32>
    tpu.vector_store %arg7[%c0_16, %c0_17], %18 {strides = array<i32>} : memref<8x128xf32, #tpu.memory_space<vmem>>, vector<8x128xf32>,
    return
  }
  func.func @transform_0(%arg0: i32) -> (i32, i32) {
    %c0_i32 = arith.constant 0 : i32
    %c0_i32_0 = arith.constant 0 : i32
    return %arg0, %c0_i32 : i32, i32
  }
  func.func @transform_1(%arg0: i32) -> (i32, i32) {
    %c0_i32 = arith.constant 0 : i32
    %c0_i32_0 = arith.constant 0 : i32
    %c0_i32_1 = arith.constant 0 : i32
    return %c0_i32, %c0_i32_0 : i32, i32
  }
  func.func @transform_2(%arg0: i32) -> (i32, i32) {
    %c0_i32 = arith.constant 0 : i32
    %c0_i32_0 = arith.constant 0 : i32
    %c0_i32_1 = arith.constant 0 : i32
    return %c0_i32, %c0_i32_0 : i32, i32
  }
  func.func @transform_3(%arg0: i32) -> (i32, i32) {
    %c0_i32 = arith.constant 0 : i32
    %c0_i32_0 = arith.constant 0 : i32
    %c0_i32_1 = arith.constant 0 : i32
    return %c0_i32, %c0_i32_0 : i32, i32
  }
  func.func @transform_4(%arg0: i32) -> (i32, i32) {
    %c0_i32 = arith.constant 0 : i32
    %c0_i32_0 = arith.constant 0 : i32
    %c0_i32_1 = arith.constant 0 : i32
    return %c0_i32, %c0_i32_0 : i32, i32
  }
  func.func @transform_5(%arg0: i32) -> (i32, i32) {
    %c0_i32 = arith.constant 0 : i32
    %c0_i32_0 = arith.constant 0 : i32
    %c0_i32_1 = arith.constant 0 : i32
    return %c0_i32, %c0_i32_0 : i32, i32
  }
  func.func @transform_6(%arg0: i32) -> (i32, i32) {
    %c0_i32 = arith.constant 0 : i32
    %c0_i32_0 = arith.constant 0 : i32
    return %arg0, %c0_i32 : i32, i32
  }
}

</mosaic_0001>

<bundles_post_ra>
// kernel: tpu_custom_call.1
= control target key start
LH: loop header
LB: loop body
LE: loop exit
PB: predicated region body
PF: predicated region fallthrough
CT: control target
= control target key end

     0   :  { %11 = vsyncpa [#allocation3], 0  ;;  %s418_s0 = inlined_call_operand.hbm [shape: f32[8,32], index: 0, kind: input, shape index: {}]   ;;  %s419_s1 = inlined_call_operand.hbm [shape: f32[32,128], index: 1, kind: input, shape index: {}]   ;;  %s420_s2 = inlined_call_operand.vmem [shape: f32[1,128], index: 2, kind: input, shape index: {}]   ;;  %s421_s3 = inlined_call_operand.hbm [shape: f32[128,128], index: 3, kind: input, shape index: {}]   ;;  %s422_s4 = inlined_call_operand.vmem [shape: f32[1,128], index: 4, kind: input, shape index: {}]   ;;  %s423_s5 = inlined_call_operand.hbm [shape: f32[128,128], index: 5, kind: input, shape index: {}]   ;;  %s424_s6 = inlined_call_operand.hbm [shape: f32[8,128], index: 6, kind: output, shape index: {}]  }
   0x1   :  { %12 = vsyncpa [#allocation6], 0 }
   0x2   :  { %13 = vsyncpa [#allocation9], 0  ;;  %s30_s23 = sshll.u32 %s419_s1, 4  ;;  %s31_s23 = int_to_ptr.hbm [resolvable:$true] %s30_s23 }
   0x3   :  { %14 = vsyncpa [#allocation4], 0  ;;  %s355_s24 = smov [#allocation5]   ;;  %s20_s28 = sshll.u32 %s418_s0, 4  ;;  %s21_s28 = int_to_ptr.hbm [resolvable:$true] %s20_s28 }
   0x4   :  { %s32_s25 = sshll.u32 %s355_s24, 4  ;;  %s356_s29 = smov 128   ;;  %s33_s25 = int_to_ptr.vmem [resolvable:$true] %s32_s25 }
   0x5   :  { %s357_s30 = smov 8   ;;  %s358_s7 = smov [#allocation2]  }
   0x6   :  { %38 = dma.hbm_to_vmem [thread:$0]  %s31_s23, 512, %s33_s25, [#allocation6], %s356_s29, %s356_s29, %s357_s30  }
   0x7   :  { %s22_s8 = sshll.u32 %s358_s7, 4  ;;  %s45_s11 = sshll.u32 %s421_s3, 4  ;;  %s23_s8 = int_to_ptr.vmem [resolvable:$true] %s22_s8  ;;  %s46_s11 = int_to_ptr.hbm [resolvable:$true] %s45_s11 }
   0x8   :  { %25 = dma.hbm_to_vmem [thread:$0]  %s21_s28, 128, %s23_s8, [#allocation3]  }
   0x9   :  { %s60_s13 = sshll.u32 %s423_s5, 4  ;;  %s359_s14 = smov [#allocation7]   ;;  %s61_s13 = int_to_ptr.hbm [resolvable:$true] %s60_s13 }
   0xa   :  { %s47_s15 = sshll.u32 %s359_s14, 4  ;;  %s360_s0 = smov [#allocation8]   ;;  %s48_s15 = int_to_ptr.vmem [resolvable:$true] %s47_s15 }
   0xb   :  { %53 = dma.hbm_to_vmem [thread:$0]  %s46_s11, 2048, %s48_s15, [#allocation6], %s356_s29, %s356_s29, %s357_s30  }
   0xc   :  { %s62_s16 = sshll.u32 %s360_s0, 4  ;;  %s63_s16 = int_to_ptr.vmem [resolvable:$true] %s62_s16 }
   0xd   :  { %68 = dma.hbm_to_vmem [thread:$0]  %s61_s13, 2048, %s63_s16, [#allocation9], %s356_s29, %s356_s29, %s357_s30  }
   0xe   :  { %347 = dma.done.wait [#allocation3], 128  }
   0xf   :  { %348 = vsyncadd [#allocation3], 4294967168 }
  0x10   :  { %349 = dma.done.wait [#allocation6], 2560  }
  0x11   :  { %350 = vsyncadd [#allocation6], 4294964736 }
  0x12   :  { %351 = dma.done.wait [#allocation9], 2048  }
  0x13   :  { %352 = vsyncadd [#allocation9], 4294965248  ;;  %v89_v0 = vld [vmem:[#allocation5 + $0x18] sm:$0xff]  ;;  %v88_v1 = vld [vmem:[#allocation5 + $0x10] sm:$0xff]  ;;  %vm94_vm0 = vcmask 261120   ;;  %s205_s22 = sshll.u32 %s424_s6, 4  ;;  %s206_s22 = int_to_ptr.hbm [resolvable:$true] %s205_s22 }
  0x14   :  { %110 = vmatpush.msra.mxu0 %v89_v0  ;;  %v134_v2 = vld [vmem:[#allocation7 + $0x78] sm:$0xff]  ;;  %v87_v3 = vld [vmem:[#allocation5 + $0x8] sm:$0xff]  ;;  %v133_v4 = vld [vmem:[#allocation7 + $0x70] sm:$0xff] }
  0x15   :  { %139 = vmatpush.msra.mxu1 %v134_v2  ;;  %v132_v5 = vld [vmem:[#allocation7 + $0x68] sm:$0xff]  ;;  %v86_v6 = vld [vmem:[#allocation5] sm:$0xff]  ;;  %v85_v7 = vld [vmem:[#allocation2] sm:$0xff] }
  0x16   :  { %111 = vmatpush.msra.mxu0 %v88_v1  ;;  %v131_v8 = vld [vmem:[#allocation7 + $0x60] sm:$0xff]  ;;  %v130_v9 = vld [vmem:[#allocation7 + $0x58] sm:$0xff]  ;;  %v129_v10 = vld [vmem:[#allocation7 + $0x50] sm:$0xff] }
  0x17   :  { %140 = vmatpush.msra.mxu1 %v133_v4  ;;  %v128_v11 = vld [vmem:[#allocation7 + $0x48] sm:$0xff]  ;;  %v127_v12 = vld [vmem:[#allocation7 + $0x40] sm:$0xff]  ;;  %v126_v13 = vld [vmem:[#allocation7 + $0x38] sm:$0xff] }
  0x18   :  { %112 = vmatpush.msra.mxu0 %v87_v3  ;;  %v125_v14 = vld [vmem:[#allocation7 + $0x30] sm:$0xff]  ;;  %v124_v15 = vld [vmem:[#allocation7 + $0x28] sm:$0xff]  ;;  %v123_v16 = vld [vmem:[#allocation7 + $0x20] sm:$0xff] }
  0x19   :  { %141 = vmatpush.msra.mxu1 %v132_v5  ;;  %v122_v17 = vld [vmem:[#allocation7 + $0x18] sm:$0xff]  ;;  %v121_v18 = vld [vmem:[#allocation7 + $0x10] sm:$0xff]  ;;  %v120_v19 = vld [vmem:[#allocation7 + $0x8] sm:$0xff] }
  0x1a   :  { %113 = vmatpush.msra.mxu0 %v86_v6  ;;  %v119_v20 = vld [vmem:[#allocation7] sm:$0xff]  ;;  %v175_v21 = vld [vmem:[#allocation8 + $0x78] sm:$0xff]  ;;  %v174_v22 = vld [vmem:[#allocation8 + $0x70] sm:$0xff] }
  0x1b   :  { %217 = vmatmul.msk.f32.vlgmr.msra.gmra.mxu0 %vm94_vm0, %v85_v7  ;;  %142 = vmatpush.msra.mxu1 %v131_v8  ;;  %v173_v23 = vld [vmem:[#allocation8 + $0x68] sm:$0xff]  ;;  %v172_v24 = vld [vmem:[#allocation8 + $0x60] sm:$0xff]  ;;  %v171_v25 = vld [vmem:[#allocation8 + $0x58] sm:$0xff] }
  0x1c   :  { %176 = vmatpush.msra.mxu2 %v175_v21  ;;  %v170_v26 = vld [vmem:[#allocation8 + $0x50] sm:$0xff]  ;;  %v169_v27 = vld [vmem:[#allocation8 + $0x48] sm:$0xff]  ;;  %v168_v28 = vld [vmem:[#allocation8 + $0x40] sm:$0xff] }
  0x1d   :  { %143 = vmatpush.msra.mxu1 %v130_v9  ;;  %v167_v29 = vld [vmem:[#allocation8 + $0x38] sm:$0xff]  ;;  %v166_v30 = vld [vmem:[#allocation8 + $0x30] sm:$0xff]  ;;  %v165_v31 = vld [vmem:[#allocation8 + $0x28] sm:$0xff] }
  0x1e   :  { %177 = vmatpush.msra.mxu2 %v174_v22  ;;  %v164_v32 = vld [vmem:[#allocation8 + $0x20] sm:$0xff]  ;;  %v163_v33 = vld [vmem:[#allocation8 + $0x18] sm:$0xff]  ;;  %v162_v38 = vld [vmem:[#allocation8 + $0x10] sm:$0xff] }
  0x1f   :  { %144 = vmatpush.msra.mxu1 %v129_v10  ;;  %v225_v34 = vld [vmem:[%s420_s2] ss:$0 sm:$0xff]  ;;  %v161_v39 = vld [vmem:[#allocation8 + $0x8] sm:$0xff]  ;;  %v160_v40 = vld [vmem:[#allocation8] sm:$0xff]  ;;  %s361_s2 = smov [#allocation10]  }
  0x20   :  { %178 = vmatpush.msra.mxu2 %v173_v23  ;;  %v226_v41 = vld [vmem:[%s422_s4] ss:$0 sm:$0xff]  ;;  %s203_s19 = sshll.u32 %s361_s2, 4  ;;  %s204_s19 = int_to_ptr.vmem [resolvable:$true] %s203_s19 }
  0x21   :  { %145 = vmatpush.msra.mxu1 %v128_v11 }
  0x22   :  { %179 = vmatpush.msra.mxu2 %v172_v24 }
  0x23   :  { %146 = vmatpush.msra.mxu1 %v127_v12 }
  0x24   :  { %180 = vmatpush.msra.mxu2 %v171_v25 }
  0x25   :  { %147 = vmatpush.msra.mxu1 %v126_v13 }
  0x26   :  { %181 = vmatpush.msra.mxu2 %v170_v26 }
  0x27   :  { %148 = vmatpush.msra.mxu1 %v125_v14 }
  0x28   :  { %182 = vmatpush.msra.mxu2 %v169_v27 }
  0x29   :  { %149 = vmatpush.msra.mxu1 %v124_v15 }
  0x2a   :  { %183 = vmatpush.msra.mxu2 %v168_v28 }
  0x2b   :  { %150 = vmatpush.msra.mxu1 %v123_v16 }
  0x2c   :  { %184 = vmatpush.msra.mxu2 %v167_v29 }
  0x2d   :  { %151 = vmatpush.msra.mxu1 %v122_v17 }
  0x2e   :  { %185 = vmatpush.msra.mxu2 %v166_v30 }
  0x2f   :  { %152 = vmatpush.msra.mxu1 %v121_v18 }
  0x30   :  { %186 = vmatpush.msra.mxu2 %v165_v31 }
  0x31   :  { %153 = vmatpush.msra.mxu1 %v120_v19 }
  0x32   :  { %187 = vmatpush.msra.mxu2 %v164_v32 }
  0x33   :  { %154 = vmatpush.msra.mxu1 %v119_v20 }
  0x34   :  { %188 = vmatpush.msra.mxu2 %v163_v33 }
  0x36   :  { %189 = vmatpush.msra.mxu2 %v162_v38 }
  0x38   :  { %190 = vmatpush.msra.mxu2 %v161_v39 }
  0x3a   :  { %191 = vmatpush.msra.mxu2 %v160_v40 }
  0x98   :  { %v115_v35 = vpop.f32.mrf.mxu0 }
  0x99   :  { %v116_v36 = vadd.f32 %v225_v34, %v115_v35 }
  0x9b   :  { %v118_v37 = vmax.f32 %v116_v36, 0.0 }
  0x9d   :  { %155 = vmatmul.f32.vlgmr.msra.gmra.mxu1 %v118_v37 }
 0x11a   :  { %v156_v42 = vpop.f32.mrf.mxu1 }
 0x11b   :  { %v157_v43 = vadd.f32 %v226_v41, %v156_v42 }
 0x11d   :  { %v159_v44 = vmax.f32 %v157_v43, 0.0 }
 0x11f   :  { %192 = vmatmul.f32.vlgmr.msra.gmra.mxu2 %v159_v44 }
 0x1a2   :  { %v193_v45 = vpop.f32.mrf.mxu2 }
 0x1a3   :  { %v196_v46 = vmax.f32 %v193_v45, 0.0 }
 0x1a5   :  { %197 = vst [vmem:[#allocation10] sm:$0xff] %v196_v46 }
 0x1a6   :  { %208 = dma.vmem_to_hbm [thread:$0]  %s204_s19, 128, %s206_s22, [#allocation4]  }
 0x1a7   :  { %353 = dma.done.wait [#allocation4], 128  }
 0x1a8   :  { %354 = vsyncadd [#allocation4], 4294967168 }
 0x1a9   :  { %213 = vsyncpa [#allocation3], 1 }
 0x1aa   :  { %214 = vsyncpa [#allocation6], 1 }
 0x1ab   :  { %215 = vsyncpa [#allocation9], 1 }
 0x1ac   :  { %216 = vsyncpa [#allocation4], 1 }

</bundles_post_ra>
